<compile_context>
chip_gen: v5e
topology: v5e:2x2
jax: 0.10.0
libtpu: 0.0.40
codegen_flags: <defaults>
</compile_context>

<pallas_src>
import functools
import math

import jax
import jax.numpy as jnp
from jax.experimental import pallas as pl
from jax.experimental.pallas import tpu as pltpu


def _round_up(v, m):
    return (v + m - 1) // m * m


def _tcn_kernel(x_ref, w_ref, p_ref, o_ref, *, K, T_out, use_roll):
    """One (batch-tile, node-tile) grid step.

    x_ref: (tile_b, T, Lin)       lane-flattened input, Lin = tile_n*C_in (node-major)
    w_ref: (2, K, Lin, Lout)      block-diagonal conv1/conv2 tap weights (MXU dtype)
    p_ref: (4, Lout)              rows = [bias1, bias2, bn_scale, bn_shift], node-tiled, f32
    o_ref: (tile_b, T_out, Lout)  lane-flattened output, Lout = tile_n*C_out (node-major)
    """
    tile_b, T, _ = x_ref.shape
    Lout = o_ref.shape[-1]
    cdtype = w_ref.dtype

    p = p_ref[...]                      # (4, Lout), hoisted single load
    b1, b2 = p[0:1], p[1:2]
    scale, shift = p[2:3], p[3:4]

    rows = T if use_roll else T_out
    for b in range(tile_b):             # static unroll, tile_b is small
        xb = x_ref[b]                   # (T, Lin)
        acc1 = jnp.zeros((rows, Lout), jnp.float32)
        acc2 = jnp.zeros((rows, Lout), jnp.float32)
        for k in range(K):              # static unroll over temporal taps
            if use_roll:
                # Sublane rotate (XLU slot): xk[t] = xb[t + k] for t < T_out; the
                # wrapped rows t >= T_out are garbage and are discarded below.
                xk = xb if k == 0 else pltpu.roll(xb, T - k, axis=0)
            else:
                xk = xb[k:k + T_out]
            xk = xk.astype(cdtype)
            acc1 = acc1 + jnp.dot(xk, w_ref[0, k], preferred_element_type=jnp.float32)
            acc2 = acc2 + jnp.dot(xk, w_ref[1, k], preferred_element_type=jnp.float32)
        if use_roll:
            acc1, acc2 = acc1[:T_out], acc2[:T_out]
        gated = jnp.maximum(acc1 + b1, 0.0) * jax.nn.sigmoid(acc2 + b2)
        o_ref[b] = (gated * scale + shift).astype(o_ref.dtype)


def _pick_tile_n(N, C_in, C_out, cap=64):
    """Largest node tile keeping every block's last dim lane-dense (or full).

    Valid tiles are multiples of q = lcm(128/gcd(128,C_in), 128/gcd(128,C_out)) that
    divide N (so tile_n*C_in and tile_n*C_out are multiples of 128), else tile_n = N
    (full last dim, always legal).  cap bounds the block-diagonal flop inflation.
    """
    q_in = 128 // math.gcd(128, C_in)
    q_out = 128 // math.gcd(128, C_out)
    q = q_in * q_out // math.gcd(q_in, q_out)
    cap = max(cap, q)
    cands = [d for d in range(q, min(N, cap) + 1, q) if N % d == 0]
    return (max(cands) if cands else N), q


def _vmem_footprint(tile_b, T, T_out, tile_n, C_in, C_out, K, x_item, o_item, w_item):
    """(8,128)-padded, double-buffered VMEM footprint of all pipeline blocks."""
    lin, lout = tile_n * C_in, tile_n * C_out
    x_blk = tile_b * _round_up(T, 8) * _round_up(lin, 128) * x_item
    o_blk = tile_b * _round_up(T_out, 8) * _round_up(lout, 128) * o_item
    w_blk = 2 * K * _round_up(lin, 8) * _round_up(lout, 128) * w_item
    p_blk = 8 * _round_up(lout, 128) * 4
    acc = 2 * _round_up(T, 8) * _round_up(lout, 128) * 4          # f32 accumulators
    return 2 * (x_blk + o_blk + w_blk + p_blk) + acc + (2 << 20)   # 2x = double buffering


def tcn_layer(x, w1, b1, w2, b2, gamma, beta, running_mean, running_var,
              eps=1e-5, mxu_dtype=jnp.bfloat16, out_dtype=None,
              tile_n=None, tile_b=None):
    """x: (B, T, N, C_in).  Returns (B, T-K+1, N, C_out) (eval-mode TCNLayer forward)."""
    B, T, N, C_in = x.shape
    K, _, C_out = w1.shape
    T_out = T - K + 1
    out_dtype = jnp.dtype(x.dtype) if out_dtype is None else jnp.dtype(out_dtype)

    # ---- generation-aware VMEM budget (64 MiB on v7x, 128 MiB on v5e/v6e) ----
    try:
        phys_vmem = int(pltpu.get_tpu_info().vmem_capacity_bytes)
    except Exception:
        phys_vmem = 64 << 20                      # v7x worst case
    budget = phys_vmem // 2

    # ---- tile selection ----
    if tile_n is None:
        tile_n, q = _pick_tile_n(N, C_in, C_out)
    else:
        q = tile_n
    assert N % tile_n == 0, "tile_n must divide N"

    if tile_b is None:
        target = min(16, max(1, -(-64 // max(T_out, 1))))     # ~64 M rows per step
        tile_b = max(d for d in range(1, B + 1) if B % d == 0 and d <= target)
        # keep >= 2 grid steps when possible (pipelining; v7x has 2 TensorCores)
        while tile_b > 1 and (B // tile_b) * (N // tile_n) < 2:
            tile_b = max(d for d in range(1, tile_b) if B % d == 0)
    assert B % tile_b == 0, "tile_b must divide B"

    x_item = jnp.dtype(x.dtype).itemsize
    o_item = out_dtype.itemsize
    w_item = jnp.dtype(mxu_dtype).itemsize
    fp = _vmem_footprint(tile_b, T, T_out, tile_n, C_in, C_out, K, x_item, o_item, w_item)
    while fp > budget and tile_b > 1:
        tile_b = max(d for d in range(1, tile_b) if B % d == 0)
        fp = _vmem_footprint(tile_b, T, T_out, tile_n, C_in, C_out, K, x_item, o_item, w_item)
    while fp > budget:
        smaller = [d for d in range(q, tile_n, q) if N % d == 0]
        if not smaller:
            break
        tile_n = max(smaller)
        fp = _vmem_footprint(tile_b, T, T_out, tile_n, C_in, C_out, K, x_item, o_item, w_item)
    vmem_limit = int(min(phys_vmem * 3 // 4, max(48 << 20, fp + (8 << 20))))

    Lin, Lout = tile_n * C_in, tile_n * C_out

    # ---- lane-flattened layouts: (node, channel) merged into the 128-lane axis ----
    x_flat = x.reshape(B, T, N * C_in)

    # Block-diagonal per-tap weights (node-identity ⊗ W_k): rows (n, ci) -> cols (n, co),
    # so the matmul result lands directly in the lane-dense output layout.
    eye = jnp.eye(tile_n, dtype=jnp.float32)
    w1_blk = jnp.einsum('nm,kcd->kncmd', eye, w1.astype(jnp.float32)).reshape(K, Lin, Lout)
    w2_blk = jnp.einsum('nm,kcd->kncmd', eye, w2.astype(jnp.float32)).reshape(K, Lin, Lout)
    w_blk = jnp.stack([w1_blk, w2_blk]).astype(mxu_dtype)          # (2, K, Lin, Lout)

    # Eval-mode BatchNorm folded to per-channel scale/shift; biases + BN tiled over nodes.
    scale = gamma / jnp.sqrt(running_var + eps)
    shift = beta - running_mean * scale
    params = jnp.stack([jnp.tile(b1, tile_n), jnp.tile(b2, tile_n),
                        jnp.tile(scale, tile_n), jnp.tile(shift, tile_n)]
                       ).astype(jnp.float32)                        # (4, Lout)

    grid = (B // tile_b, N // tile_n)
    out_flat = pl.pallas_call(
        functools.partial(_tcn_kernel, K=K, T_out=T_out, use_roll=(T % 8 == 0)),
        out_shape=jax.ShapeDtypeStruct((B, T_out, N * C_out), out_dtype),
        grid_spec=pltpu.PrefetchScalarGridSpec(
            num_scalar_prefetch=0,
            grid=grid,
            in_specs=[
                pl.BlockSpec((tile_b, T, Lin), lambda ib, jn: (ib, 0, jn)),
                pl.BlockSpec((2, K, Lin, Lout), lambda ib, jn: (0, 0, 0, 0)),
                pl.BlockSpec((4, Lout), lambda ib, jn: (0, 0)),
            ],
            out_specs=pl.BlockSpec((tile_b, T_out, Lout), lambda ib, jn: (ib, 0, jn)),
        ),
        compiler_params=pltpu.CompilerParams(
            dimension_semantics=("parallel", "parallel"),
            vmem_limit_bytes=vmem_limit),
    )(x_flat, w_blk, params)

    return out_flat.reshape(B, T_out, N, C_out)


def _reference(x, w1, b1, w2, b2, gamma, beta, running_mean, running_var, eps=1e-5):
    """Pure-JAX f32 reference of the same forward pass (channels-last)."""
    K = w1.shape[0]
    T_out = x.shape[1] - K + 1

    def conv(w, b):
        acc = b
        for k in range(K):
            acc = acc + jnp.einsum('btnc,cd->btnd', x[:, k:k + T_out], w[k])
        return acc

    out = jax.nn.relu(conv(w1, b1)) * jax.nn.sigmoid(conv(w2, b2))
    scale = gamma / jnp.sqrt(running_var + eps)
    shift = beta - running_mean * scale
    return out * scale + shift


if __name__ == "__main__":
    B, T, N = 2, 8, 16
    C_in, C_out, K = 4, 8, 3

    key = jax.random.PRNGKey(0)
    kx, k1, k2, k3, k4, k5, k6 = jax.random.split(key, 7)

    x = jax.random.normal(kx, (B, T, N, C_in), jnp.float32)

    # Conv2d weight in PyTorch is (C_out, C_in, 1, K); stored tap-major (K, C_in, C_out)
    # for the channels-last matmul formulation.
    w1 = 0.1 * jax.random.normal(k1, (K, C_in, C_out), jnp.float32)
    b1 = 0.1 * jax.random.normal(k2, (C_out,), jnp.float32)
    w2 = 0.1 * jax.random.normal(k3, (K, C_in, C_out), jnp.float32)
    b2 = 0.1 * jax.random.normal(k4, (C_out,), jnp.float32)

    # Deterministic (non-trivial) BatchNorm eval-mode parameters.
    gamma = 1.0 + 0.1 * jax.random.normal(k5, (C_out,), jnp.float32)
    beta = 0.1 * jax.random.normal(k6, (C_out,), jnp.float32)
    running_mean = jnp.linspace(-0.2, 0.2, C_out, dtype=jnp.float32)
    running_var = jnp.linspace(0.8, 1.2, C_out, dtype=jnp.float32)

    ref = _reference(x, w1, b1, w2, b2, gamma, beta, running_mean, running_var)

    # Exact path (f32 matmul operands) -- tight check against the pure-JAX reference.
    out_f32 = jax.block_until_ready(
        tcn_layer(x, w1, b1, w2, b2, gamma, beta, running_mean, running_var,
                  mxu_dtype=jnp.float32))
    assert out_f32.shape == (B, T - K + 1, N, C_out)
    assert jnp.allclose(out_f32, ref, atol=1e-4, rtol=1e-4)

    # Performance path (bf16 MXU operands, f32 accumulate / epilogue).
    out_bf16 = jax.block_until_ready(
        tcn_layer(x, w1, b1, w2, b2, gamma, beta, running_mean, running_var))
    assert out_bf16.shape == (B, T - K + 1, N, C_out)
    assert jnp.allclose(out_bf16, ref, atol=5e-2, rtol=5e-2)

    print("KERNEL_OK")
</pallas_src>

<mosaic_0001>
module attributes {stable_mosaic.version = 11 : i64} {
  func.func @_tcn_kernel(%arg0: i32, %arg1: i32, %arg2: memref<1x8x64xf32, #tpu.memory_space<vmem>>, %arg3: memref<2x3x64x128xf32, #tpu.memory_space<vmem>>, %arg4: memref<4x128xf32, #tpu.memory_space<vmem>>, %arg5: memref<1x6x128xf32, #tpu.memory_space<vmem>>) attributes {dimension_semantics = [#tpu.dimension_semantics<parallel>, #tpu.dimension_semantics<parallel>], iteration_bounds = array<i64: 2, 1>, scalar_prefetch = 0 : i64, scratch_operands = 0 : i64, tpu.core_type = #tpu.core_type<tc>, window_params = [{transform_indices = @transform_0, window_bounds = array<i64: 1, 8, 64>}, {pipeline_mode = #tpu.pipeline_mode<synchronous>, transform_indices = @transform_1, window_bounds = array<i64: 2, 3, 64, 128>}, {pipeline_mode = #tpu.pipeline_mode<synchronous>, transform_indices = @transform_2, window_bounds = array<i64: 4, 128>}, {transform_indices = @transform_3, window_bounds = array<i64: 1, 6, 128>}]} {
    %c0 = arith.constant 0 : index
    %c0_0 = arith.constant 0 : index
    %0 = vector.load %arg4[%c0, %c0_0] : memref<4x128xf32, #tpu.memory_space<vmem>>, vector<4x128xf32>
    %1 = vector.extract_strided_slice %0 {offsets = [0, 0], sizes = [1, 128], strides = [1, 1]} : vector<4x128xf32> to vector<1x128xf32>
    %2 = vector.extract_strided_slice %0 {offsets = [1, 0], sizes = [1, 128], strides = [1, 1]} : vector<4x128xf32> to vector<1x128xf32>
    %3 = vector.extract_strided_slice %0 {offsets = [2, 0], sizes = [1, 128], strides = [1, 1]} : vector<4x128xf32> to vector<1x128xf32>
    %4 = vector.extract_strided_slice %0 {offsets = [3, 0], sizes = [1, 128], strides = [1, 1]} : vector<4x128xf32> to vector<1x128xf32>
    %c0_1 = arith.constant 0 : index
    %c0_2 = arith.constant 0 : index
    %c0_3 = arith.constant 0 : index
    %5 = vector.load %arg2[%c0_1, %c0_2, %c0_3] : memref<1x8x64xf32, #tpu.memory_space<vmem>>, vector<1x8x64xf32>
    %6 = vector.shape_cast %5 : vector<1x8x64xf32> to vector<8x64xf32>
    %cst = arith.constant 0.000000e+00 : f32
    %7 = vector.broadcast %cst : f32 to vector<8x128xf32>
    %cst_4 = arith.constant 0.000000e+00 : f32
    %8 = vector.broadcast %cst_4 : f32 to vector<8x128xf32>
    %c0_5 = arith.constant 0 : index
    %c0_6 = arith.constant 0 : index
    %c0_7 = arith.constant 0 : index
    %c0_8 = arith.constant 0 : index
    %9 = vector.load %arg3[%c0_5, %c0_6, %c0_7, %c0_8] : memref<2x3x64x128xf32, #tpu.memory_space<vmem>>, vector<1x1x64x128xf32>
    %10 = vector.shape_cast %9 : vector<1x1x64x128xf32> to vector<64x128xf32>
    %cst_9 = arith.constant dense<0.000000e+00> : vector<8x128xf32>
    %11 = tpu.matmul %6, %10, %cst_9 {dimension_numbers = #tpu.dot_dimension_numbers<[1], [0], [0], [1], [0, 0, 1, 1], [], []>} : vector<8x64xf32>, vector<64x128xf32>, vector<8x128xf32> -> vector<8x128xf32>
    %12 = arith.addf %7, %11 : vector<8x128xf32>
    %c1 = arith.constant 1 : index
    %c0_10 = arith.constant 0 : index
    %c0_11 = arith.constant 0 : index
    %c0_12 = arith.constant 0 : index
    %13 = vector.load %arg3[%c1, %c0_10, %c0_11, %c0_12] : memref<2x3x64x128xf32, #tpu.memory_space<vmem>>, vector<1x1x64x128xf32>
    %14 = vector.shape_cast %13 : vector<1x1x64x128xf32> to vector<64x128xf32>
    %cst_13 = arith.constant dense<0.000000e+00> : vector<8x128xf32>
    %15 = tpu.matmul %6, %14, %cst_13 {dimension_numbers = #tpu.dot_dimension_numbers<[1], [0], [0], [1], [0, 0, 1, 1], [], []>} : vector<8x64xf32>, vector<64x128xf32>, vector<8x128xf32> -> vector<8x128xf32>
    %16 = arith.addf %8, %15 : vector<8x128xf32>
    %c7_i32 = arith.constant 7 : i32
    %17 = tpu.dynamic_rotate %6 by %c7_i32 dim 0 : vector<8x64xf32>, i32 -> vector<8x64xf32>
    %c0_14 = arith.constant 0 : index
    %c1_15 = arith.constant 1 : index
    %c0_16 = arith.constant 0 : index
    %c0_17 = arith.constant 0 : index
    %18 = vector.load %arg3[%c0_14, %c1_15, %c0_16, %c0_17] : memref<2x3x64x128xf32, #tpu.memory_space<vmem>>, vector<1x1x64x128xf32>
    %19 = vector.shape_cast %18 : vector<1x1x64x128xf32> to vector<64x128xf32>
    %cst_18 = arith.constant dense<0.000000e+00> : vector<8x128xf32>
    %20 = tpu.matmul %17, %19, %cst_18 {dimension_numbers = #tpu.dot_dimension_numbers<[1], [0], [0], [1], [0, 0, 1, 1], [], []>} : vector<8x64xf32>, vector<64x128xf32>, vector<8x128xf32> -> vector<8x128xf32>
    %21 = arith.addf %12, %20 : vector<8x128xf32>
    %c1_19 = arith.constant 1 : index
    %c1_20 = arith.constant 1 : index
    %c0_21 = arith.constant 0 : index
    %c0_22 = arith.constant 0 : index
    %22 = vector.load %arg3[%c1_19, %c1_20, %c0_21, %c0_22] : memref<2x3x64x128xf32, #tpu.memory_space<vmem>>, vector<1x1x64x128xf32>
    %23 = vector.shape_cast %22 : vector<1x1x64x128xf32> to vector<64x128xf32>
    %cst_23 = arith.constant dense<0.000000e+00> : vector<8x128xf32>
    %24 = tpu.matmul %17, %23, %cst_23 {dimension_numbers = #tpu.dot_dimension_numbers<[1], [0], [0], [1], [0, 0, 1, 1], [], []>} : vector<8x64xf32>, vector<64x128xf32>, vector<8x128xf32> -> vector<8x128xf32>
    %25 = arith.addf %16, %24 : vector<8x128xf32>
    %c6_i32 = arith.constant 6 : i32
    %26 = tpu.dynamic_rotate %6 by %c6_i32 dim 0 : vector<8x64xf32>, i32 -> vector<8x64xf32>
    %c0_24 = arith.constant 0 : index
    %c2 = arith.constant 2 : index
    %c0_25 = arith.constant 0 : index
    %c0_26 = arith.constant 0 : index
    %27 = vector.load %arg3[%c0_24, %c2, %c0_25, %c0_26] : memref<2x3x64x128xf32, #tpu.memory_space<vmem>>, vector<1x1x64x128xf32>
    %28 = vector.shape_cast %27 : vector<1x1x64x128xf32> to vector<64x128xf32>
    %cst_27 = arith.constant dense<0.000000e+00> : vector<8x128xf32>
    %29 = tpu.matmul %26, %28, %cst_27 {dimension_numbers = #tpu.dot_dimension_numbers<[1], [0], [0], [1], [0, 0, 1, 1], [], []>} : vector<8x64xf32>, vector<64x128xf32>, vector<8x128xf32> -> vector<8x128xf32>
    %30 = arith.addf %21, %29 : vector<8x128xf32>
    %c1_28 = arith.constant 1 : index
    %c2_29 = arith.constant 2 : index
    %c0_30 = arith.constant 0 : index
    %c0_31 = arith.constant 0 : index
    %31 = vector.load %arg3[%c1_28, %c2_29, %c0_30, %c0_31] : memref<2x3x64x128xf32, #tpu.memory_space<vmem>>, vector<1x1x64x128xf32>
    %32 = vector.shape_cast %31 : vector<1x1x64x128xf32> to vector<64x128xf32>
    %cst_32 = arith.constant dense<0.000000e+00> : vector<8x128xf32>
    %33 = tpu.matmul %26, %32, %cst_32 {dimension_numbers = #tpu.dot_dimension_numbers<[1], [0], [0], [1], [0, 0, 1, 1], [], []>} : vector<8x64xf32>, vector<64x128xf32>, vector<8x128xf32> -> vector<8x128xf32>
    %34 = arith.addf %25, %33 : vector<8x128xf32>
    %35 = vector.extract_strided_slice %30 {offsets = [0, 0], sizes = [6, 128], strides = [1, 1]} : vector<8x128xf32> to vector<6x128xf32>
    %36 = vector.extract_strided_slice %34 {offsets = [0, 0], sizes = [6, 128], strides = [1, 1]} : vector<8x128xf32> to vector<6x128xf32>
    %37 = vector.broadcast %1 : vector<1x128xf32> to vector<6x128xf32>
    %38 = arith.addf %35, %37 : vector<6x128xf32>
    %cst_33 = arith.constant 0.000000e+00 : f32
    %39 = vector.broadcast %cst_33 : f32 to vector<6x128xf32>
    %40 = arith.maximumf %38, %39 : vector<6x128xf32>
    %41 = vector.broadcast %2 : vector<1x128xf32> to vector<6x128xf32>
    %42 = arith.addf %36, %41 : vector<6x128xf32>
    %43 = arith.negf %42 : vector<6x128xf32>
    %44 = math.exp %43 : vector<6x128xf32>
    %cst_34 = arith.constant 1.000000e+00 : f32
    %45 = vector.broadcast %cst_34 : f32 to vector<6x128xf32>
    %46 = arith.addf %45, %44 : vector<6x128xf32>
    %47 = arith.divf %45, %46 : vector<6x128xf32>
    %48 = arith.mulf %40, %47 : vector<6x128xf32>
    %49 = vector.broadcast %3 : vector<1x128xf32> to vector<6x128xf32>
    %50 = arith.mulf %48, %49 : vector<6x128xf32>
    %51 = vector.broadcast %4 : vector<1x128xf32> to vector<6x128xf32>
    %52 = arith.addf %50, %51 : vector<6x128xf32>
    %c0_35 = arith.constant 0 : index
    %c0_36 = arith.constant 0 : index
    %c0_37 = arith.constant 0 : index
    %53 = vector.load %arg5[%c0_35, %c0_36, %c0_37] : memref<1x6x128xf32, #tpu.memory_space<vmem>>, vector<1x6x128xf32>
    %54 = vector.shape_cast %53 : vector<1x6x128xf32> to vector<6x128xf32>
    %55 = vector.shape_cast %52 : vector<6x128xf32> to vector<1x6x128xf32>
    tpu.vector_store %arg5[%c0_35, %c0_36, %c0_37], %55 {strides = array<i32>} : memref<1x6x128xf32, #tpu.memory_space<vmem>>, vector<1x6x128xf32>,
    return
  }
  func.func @transform_0(%arg0: i32, %arg1: i32) -> (i32, i32, i32) {
    %c0_i32 = arith.constant 0 : i32
    %c0_i32_0 = arith.constant 0 : i32
    return %arg0, %c0_i32, %arg1 : i32, i32, i32
  }
  func.func @transform_1(%arg0: i32, %arg1: i32) -> (i32, i32, i32, i32) {
    %c0_i32 = arith.constant 0 : i32
    %c0_i32_0 = arith.constant 0 : i32
    %c0_i32_1 = arith.constant 0 : i32
    %c0_i32_2 = arith.constant 0 : i32
    %c0_i32_3 = arith.constant 0 : i32
    return %c0_i32, %c0_i32_0, %c0_i32_1, %c0_i32_2 : i32, i32, i32, i32
  }
  func.func @transform_2(%arg0: i32, %arg1: i32) -> (i32, i32) {
    %c0_i32 = arith.constant 0 : i32
    %c0_i32_0 = arith.constant 0 : i32
    %c0_i32_1 = arith.constant 0 : i32
    return %c0_i32, %c0_i32_0 : i32, i32
  }
  func.func @transform_3(%arg0: i32, %arg1: i32) -> (i32, i32, i32) {
    %c0_i32 = arith.constant 0 : i32
    %c0_i32_0 = arith.constant 0 : i32
    return %arg0, %c0_i32, %arg1 : i32, i32, i32
  }
}

</mosaic_0001>

<bundles_post_ra>
// kernel: tpu_custom_call.1
= control target key start
LH: loop header
LB: loop body
LE: loop exit
PB: predicated region body
PF: predicated region fallthrough
CT: control target
= control target key end

     0   :  { %8 = vsyncpa [#allocation3], 0  ;;  %s966_s0 = inlined_call_operand.hbm [shape: f32[2,8,64], index: 0, kind: input, shape index: {}]   ;;  %s967_s1 = inlined_call_operand.hbm [shape: f32[2,3,64,128], index: 1, kind: input, shape index: {}]   ;;  %s968_s2 = inlined_call_operand.hbm [shape: f32[4,128], index: 2, kind: input, shape index: {}]   ;;  %s969_s3 = inlined_call_operand.vmem [shape: f32[2,6,128], index: 3, kind: output, shape index: {}]  }
   0x1   :  { %10 = vsyncpa [#allocation3 + $0x1], 0 }
   0x2   :  { %11 = vsyncpa [#allocation5], 0  ;;  %s838_s12 = smov 0   ;;  %s840_s13 = smov 0  }
   0x3   :  { %s842_s14 = smov 0   ;;  %s844_s15 = smov 0  }
   0x4   :  { %s846_s16 = smov 0   ;;  %s848_s17 = smov 0  }
   0x5 LB: > { %s564_s18 = sadd.s32 4294967295, %s812_s17   ;;  %p566_p0 = scmp.ge.s32.totalorder %s812_s17, 1  ;;  %s812_s17 = sphi %s848_s17, %s17_s17   ;;  %s808_s16 = sphi %s846_s16, %s978_s16   ;;  %s804_s15 = sphi %s844_s15, %s977_s15   ;;  %s800_s14 = sphi %s842_s14, %s976_s14   ;;  %s796_s13 = sphi %s840_s13, %s975_s13   ;;  %s792_s12 = sphi %s838_s12, %s974_s12  }
   0x6   : > { %p870_p1 = scmp.eq.s32.totalorder %s564_s18, 0  ;;  %p132_p2 = scmp.lt.s32.totalorder %s812_s17, 3 }
   0x7   : > { %s143_s22 = sshll.u32 %s967_s1, 4  ;;  %s814_s24 = smov [#allocation4]   ;;  %s144_s22 = int_to_ptr.hbm [resolvable:$true] %s143_s22 }
   0x8   : > { %p878_p3 = pnand %p566_p0, %p132_p2  ;;  %s145_s25 = sshll.u32 %s814_s24, 4  ;;  %s146_s25 = int_to_ptr.vmem [resolvable:$true] %s145_s25 }
   0x9   : > { %s158_s28 = sshll.u32 %s968_s2, 4  ;;  %s815_s29 = smov 128   ;;  %s159_s28 = int_to_ptr.hbm [resolvable:$true] %s158_s28 }
   0xa   : > { %p596_p4 = pneg %p878_p3  ;;  %s816_s30 = smov 8  }
   0xb   : > { %s817_s4 = smov [#allocation6]   ;;  %s29_s6 = sadd.s32 1, %s808_s16 }
   0xc   : > { %p597_p5 = pnand %p596_p4, %p870_p1  ;;  %s160_s5 = sshll.u32 %s817_s4, 4  ;;  %s161_s5 = int_to_ptr.vmem [resolvable:$true] %s160_s5 }
   0xd   : > { %s38_s7 = sadd.s32 1, %s800_s14  ;;  %p31_p6 = scmp.ge.s32.totalorder %s29_s6, 2 }
   0xe   : > { %599 = dma.hbm_to_vmem [thread:$0]  (!%p597_p5), %s144_s22, 6144, %s146_s25, [#allocation5], %s815_s29, %s815_s29, %s816_s30  }
   0xf   : > { %602 = dma.hbm_to_vmem [thread:$0]  (!%p597_p5), %s159_s28, 64, %s161_s5, [#allocation5]  }
  0x10   : > { %p45_p7 = scmp.ne.s32.totalorder %s800_s14, %s796_s13  ;;  %p46_p8 = scmp.eq.s32.totalorder %s812_s17, 0 }
  0x11   : > { %p51_p9 = scmp.ne.s32.totalorder %s796_s13, %s792_s12  ;;  %s980_s6 = smov (%p31_p6, %s29_s6), 0 }
  0x12   : > { %p898_p10 = por %p46_p8, %p45_p7  ;;  %s33_s10 = ssub.s32 %s808_s16, %s980_s6 }
  0x13   : > { %p904_p11 = por %p870_p1, %p51_p9  ;;  %p609_p12 = scmp.lt.s32.totalorder %s812_s17, 2 }
  0x14   : > { %p36_p13 = scmp.eq.s32.totalorder %s33_s10, 0  ;;  %s171_s11 = sand.u32 1, %s800_s14  }
  0x15   : > { %s570_s18 = sshll.u32 %s171_s11, 3  ;;  %s571_s12 = sshll.u32 %s808_s16, 3 }
  0x16   : > { %s913_s20 = scalar_select %p36_p13, %s800_s14, %s38_s7  }
  0x17   : > { %s180_s24 = scalar_lea.hbm %s966_s0, %s571_s12  ;;  %s175_s25 = scalar_lea.vmem [#allocation2], %s570_s18 }
  0x18   : > { %s184_s26 = sshll.u32 %s175_s25, 4  ;;  %s182_s27 = sshll.u32 %s180_s24, 4  ;;  %s185_s26 = int_to_ptr.vmem [resolvable:$true] %s184_s26  ;;  %s183_s27 = int_to_ptr.hbm [resolvable:$true] %s182_s27 }
  0x19   : > { %p604_p0 = pnand %p609_p12, %p898_p10  ;;  %s172_s28 = scalar_lea.sflag [#allocation3], %s171_s11 }
  0x1a   : > { %193 = sbr.rel (%p878_p3) target bundleno = 232 (0xe8), region = 32  ;;  %s195_s29 = sand.u32 (!%p878_p3), 1, %s796_s13  }
  0x1b   : > { %606 = dma.hbm_to_vmem [thread:$0]  (!%p604_p0), %s183_s27, 128, %s185_s26, %s172_s28  }
  0x1c   : > { %s924_s30 = sshll.u32 (!%p878_p3), %s195_s29, 3  ;;  %s196_s4 = scalar_lea.sflag (!%p878_p3), [#allocation3], %s195_s29 }
  0x1d   : > { %s199_s5 = scalar_lea.vmem (!%p878_p3), [#allocation2], %s924_s30 }
  0x1f   : > { %783 = dma.done.wait (%p904_p11), %s196_s4, 128  }
  0x20   : > { %785 = vsyncadd (%p904_p11), %s196_s4, 4294967168 }
  0x21   : > { %787 = dma.done.wait (%p870_p1), [#allocation5], 6208  }
  0x22   : > { %789 = vsyncadd (%p870_p1), [#allocation5], 4294961088  ;;  %v270_v0 = vld [vmem:[#allocation4 + $0x78] sm:$0xff]  ;;  %v269_v2 = vld [vmem:[#allocation4 + $0x70] sm:$0xff]  ;;  %vm271_vm0 = vcmask 523264   ;;  %p235_p1 = scmp.lt.s32.totalorder %s804_s15, 1 }
  0x23   : > { %v251_v1 = vld [vmem:[#allocation4 + $0x38] sm:$0xff]  ;;  %283 = vmatpush.msra.mxu0 %v270_v0  ;;  %v250_v3 = vld [vmem:[#allocation4 + $0x30] sm:$0xff]  ;;  %v268_v4 = vld [vmem:[#allocation4 + $0x68] sm:$0xff] }
  0x24   : > { %306 = vmatpush.msra.mxu1 %v251_v1  ;;  %v249_v5 = vld [vmem:[#allocation4 + $0x28] sm:$0xff]  ;;  %v326_v6 = vld [vmem:[#allocation4 + $0x138] sm:$0xff]  ;;  %v267_v7 = vld [vmem:[#allocation4 + $0x60] sm:$0xff]  ;;  %s982_s15 = smov (!%p235_p1, %s804_s15), 1 }
  0x25   : > { %284 = vmatpush.msra.mxu0 %v269_v2  ;;  %v260_v8 = vld [vmem:[#allocation4 + $0xf8] sm:$0xff]  ;;  %v248_v9 = vld [vmem:[#allocation4 + $0x20] sm:$0xff]  ;;  %335 = vmatpush.msra.mxu2 %v326_v6  ;;  %v325_v10 = vld [vmem:[#allocation4 + $0x130] sm:$0xff]  ;;  %s576_s19 = sshll.u32 %s982_s15, 3 }
  0x26   : > { %307 = vmatpush.msra.mxu1 %v250_v3  ;;  %355 = vmatpush.msra.mxu3 %v260_v8  ;;  %v259_v11 = vld [vmem:[#allocation4 + $0xf0] sm:$0xff]  ;;  %v324_v12 = vld [vmem:[#allocation4 + $0x128] sm:$0xff]  ;;  %v266_v14 = vld [vmem:[#allocation4 + $0x58] sm:$0xff]  ;;  %s241_s8 = scalar_lea.vmem %s969_s3, %s576_s19 }
  0x27   : > { %285 = vmatpush.msra.mxu0 %v268_v4  ;;  %v258_v13 = vld [vmem:[#allocation4 + $0xe8] sm:$0xff]  ;;  %v247_v15 = vld [vmem:[#allocation4 + $0x18] sm:$0xff]  ;;  %336 = vmatpush.msra.mxu2 %v325_v10  ;;  %v323_v16 = vld [vmem:[#allocation4 + $0x120] sm:$0xff] }
  0x28   : > { %308 = vmatpush.msra.mxu1 %v249_v5  ;;  %356 = vmatpush.msra.mxu3 %v259_v11  ;;  %v257_v17 = vld [vmem:[#allocation4 + $0xe0] sm:$0xff]  ;;  %v265_v18 = vld [vmem:[#allocation4 + $0x50] sm:$0xff]  ;;  %v322_v20 = vld [vmem:[#allocation4 + $0x118] sm:$0xff] }
  0x29   : > { %286 = vmatpush.msra.mxu0 %v267_v7  ;;  %v246_v19 = vld [vmem:[#allocation4 + $0x10] sm:$0xff]  ;;  %337 = vmatpush.msra.mxu2 %v324_v12  ;;  %v256_v21 = vld [vmem:[#allocation4 + $0xd8] sm:$0xff]  ;;  %v264_v22 = vld [vmem:[#allocation4 + $0x48] sm:$0xff] }
  0x2a   : > { %309 = vmatpush.msra.mxu1 %v248_v9  ;;  %357 = vmatpush.msra.mxu3 %v258_v13  ;;  %v245_v23 = vld [vmem:[#allocation4 + $0x8] sm:$0xff]  ;;  %v321_v24 = vld [vmem:[#allocation4 + $0x110] sm:$0xff]  ;;  %v263_v26 = vld [vmem:[#allocation4 + $0x40] sm:$0xff] }
  0x2b   : > { %287 = vmatpush.msra.mxu0 %v266_v14  ;;  %338 = vmatpush.msra.mxu2 %v323_v16  ;;  %v255_v25 = vld [vmem:[#allocation4 + $0xd0] sm:$0xff]  ;;  %v244_v27 = vld [vmem:[#allocation4] sm:$0xff]  ;;  %v376_v28 = vld [vmem:[#allocation4 + $0xb8] sm:$0xff] }
  0x2c   : > { %310 = vmatpush.msra.mxu1 %v247_v15  ;;  %358 = vmatpush.msra.mxu3 %v257_v17  ;;  %v409_v29 = vld [vmem:[#allocation4 + $0x178] sm:$0xff]  ;;  %v320_v30 = vld [vmem:[#allocation4 + $0x108] sm:$0xff]  ;;  %v375_v33 = vld [vmem:[#allocation4 + $0xb0] sm:$0xff] }
  0x2d   : > { %288 = vmatpush.msra.mxu0 %v265_v18  ;;  %339 = vmatpush.msra.mxu2 %v322_v20  ;;  %v254_v31 = vld [vmem:[#allocation4 + $0xc8] sm:$0xff]  ;;  %v243_v32 = vld [vmem:[%s199_s5] sm:$0xff]  ;;  %v319_v35 = vld [vmem:[#allocation4 + $0x100] sm:$0xff] }
  0x2e   : > { %311 = vmatpush.msra.mxu1 %v246_v19  ;;  %359 = vmatpush.msra.mxu3 %v256_v21  ;;  %v408_v34 = vld [vmem:[#allocation4 + $0x170] sm:$0xff]  ;;  %v253_v36 = vld [vmem:[#allocation4 + $0xc0] sm:$0xff]  ;;  %v374_v37 = vld [vmem:[#allocation4 + $0xa8] sm:$0xff]  ;;  %v261_v39 = vrot.slane %v243_v32, 1  ;;  %v367_v50 = vrot.slane %v243_v32, 2 }
  0x2f   : > { %289 = vmatpush.msra.mxu0 %v264_v22  ;;  %340 = vmatpush.msra.mxu2 %v321_v24  ;;  %v407_v38 = vld [vmem:[#allocation4 + $0x168] sm:$0xff]  ;;  %v373_v40 = vld [vmem:[#allocation4 + $0xa0] sm:$0xff]  ;;  %v372_v42 = vld [vmem:[#allocation4 + $0x98] sm:$0xff] }
  0x30   : > { %312 = vmatpush.msra.mxu1 %v245_v23  ;;  %360 = vmatpush.msra.mxu3 %v255_v25  ;;  %v406_v41 = vld [vmem:[#allocation4 + $0x160] sm:$0xff]  ;;  %v405_v43 = vld [vmem:[#allocation4 + $0x158] sm:$0xff]  ;;  %v371_v44 = vld [vmem:[#allocation4 + $0x90] sm:$0xff] }
  0x31   : > { %290 = vmatpush.msra.mxu0 %v263_v26  ;;  %341 = vmatpush.msra.mxu2 %v320_v30  ;;  %v404_v45 = vld [vmem:[#allocation4 + $0x150] sm:$0xff]  ;;  %v370_v46 = vld [vmem:[#allocation4 + $0x88] sm:$0xff]  ;;  %v369_v48 = vld [vmem:[#allocation4 + $0x80] sm:$0xff] }
  0x32   : > { %313 = vmatpush.msra.mxu1 %v244_v27  ;;  %361 = vmatpush.msra.mxu3 %v254_v31  ;;  %v403_v47 = vld [vmem:[#allocation4 + $0x148] sm:$0xff]  ;;  %v402_v49 = vld [vmem:[#allocation4 + $0x140] sm:$0xff] }
  0x33   : > { %388 = vmatpush.msrb.mxu0 %v376_v28  ;;  %342 = vmatpush.msra.mxu2 %v319_v35  ;;  %v242_v52 = vld [vmem:[#allocation6] sm:$0xf] }
  0x34   : > { %418 = vmatpush.msrb.mxu1 %v409_v29  ;;  %362 = vmatpush.msra.mxu3 %v253_v36  ;;  %v434_v56 = vperm.slane %v242_v52, 1  ;;  %v431_v4 = vperm.slane %v242_v52, 0  ;;  %v456_v14 = vperm.slane %v242_v52, 2  ;;  %v458_v17 = vperm.slane %v242_v52, 3 }
  0x35   : > { %389 = vmatpush.msrb.mxu0 %v375_v33  ;;  %578 = vmatmul.msk.f32.vlgmr.msra.gmra.mxu1 %vm271_vm0, %v243_v32 }
  0x36   : > { %419 = vmatpush.msrb.mxu1 %v408_v34  ;;  %577 = vmatmul.msk.f32.vlgmr.msra.gmra.mxu0 %vm271_vm0, %v261_v39 }
  0x37   : > { %390 = vmatpush.msrb.mxu0 %v374_v37  ;;  %579 = vmatmul.msk.f32.vlgmr.msra.gmra.mxu2 %vm271_vm0, %v261_v39 }
  0x38   : > { %420 = vmatpush.msrb.mxu1 %v407_v38  ;;  %580 = vmatmul.msk.f32.vlgmr.msra.gmra.mxu3 %vm271_vm0, %v243_v32 }
  0x39   : > { %391 = vmatpush.msrb.mxu0 %v373_v40 }
  0x3a   : > { %421 = vmatpush.msrb.mxu1 %v406_v41 }
  0x3b   : > { %392 = vmatpush.msrb.mxu0 %v372_v42 }
  0x3c   : > { %422 = vmatpush.msrb.mxu1 %v405_v43 }
  0x3d   : > { %393 = vmatpush.msrb.mxu0 %v371_v44 }
  0x3e   : > { %423 = vmatpush.msrb.mxu1 %v404_v45 }
  0x3f   : > { %394 = vmatpush.msrb.mxu0 %v370_v46 }
  0x40   : > { %424 = vmatpush.msrb.mxu1 %v403_v47 }
  0x41   : > { %395 = vmatpush.msrb.mxu0 %v369_v48 }
  0x42   : > { %425 = vmatpush.msrb.mxu1 %v402_v49  ;;  %581 = vmatmul.msk.f32.vlgmr.msrb.gmra.mxu0 %vm271_vm0, %v367_v50 }
  0x43   : > { %582 = vmatmul.msk.f32.vlgmr.msrb.gmra.mxu1 %vm271_vm0, %v367_v50 }
  0xb2   : > { %v315_v51 = vpop.f32.mrf.mxu1 }
  0xb3   : > { %v292_v61 = vpop.f32.mrf.mxu0 }
  0xb4   : > { %v316_v1 = vadd.f32 %v315_v51, %v292_v61 }
  0xba   : > { %v344_v53 = vpop.f32.mrf.mxu2 }
  0xbb   : > { %v364_v54 = vpop.f32.mrf.mxu3 }
  0xbc   : > { %v365_v55 = vadd.f32 %v364_v54, %v344_v53 }
  0xbf   : > { %v397_v0 = vpop.f32.mrf.mxu0 }
  0xc0   : > { %v427_v57 = vpop.f32.mrf.mxu1  ;;  %v400_v3 = vadd.f32 %v397_v0, %v316_v1 }
  0xc1   : > { %v430_v58 = vadd.f32 %v427_v57, %v365_v55 }
  0xc2   : > { %v432_v8 = vadd.f32 %v431_v4, %v400_v3 }
  0xc3   : > { %v435_v59 = vadd.f32 %v434_v56, %v430_v58 }
  0xc4   : > { %v433_v13 = vmax.f32 %v432_v8, 0.0 }
  0xc5   : > { %v583_v60 = vmul.f32 -1.442695, %v435_v59 }
  0xc7   : > { %664 = vpow2.f32 %v583_v60 }
  0xcd   : > { %v665_v62 = vpop.eup %664 }
  0xce   : > { %v439_v63 = vadd.f32 1.0, %v665_v62 }
  0xd0   : > { %666 = vrcp.f32 %v439_v63  ;;  %v451_v7 = vand.u32 2147483648, %v439_v63  ;;  %v449_v10 = vand.u32 2147483647, %v439_v63  ;;  %vm445_vm2 = vweird.f32 %v439_v63 }
  0xd2   : > { %v452_v12 = vor.u32 1.1754944e-38, %v451_v7  ;;  %vm450_vm4 = vcmp.eq.f32.partialorder %v449_v10, 8.507059e+37 }
  0xd6   : > { %v667_v2 = vpop.eup %666 }
  0xd7   : > { %v441_v5 = vmul.f32 %v667_v2, %v439_v63  ;;  %vm446_vm1 = vweird.f32 %v667_v2 }
  0xd8   : > { %vm447_vm3 = vmor %vm445_vm2, %vm446_vm1 }
  0xd9   : > { %v442_v6 = vsub.f32 1.0, %v441_v5 }
  0xdb   : > { %v443_v9 = vmul.f32 %v667_v2, %v442_v6 }
  0xdd   : > { %v444_v11 = vadd.f32 %v667_v2, %v443_v9 }
  0xdf   : > { %v448_v15 = vsel %vm447_vm3, %v667_v2, %v444_v11 }
  0xe0   : > { %v453_v16 = vsel %vm450_vm4, %v452_v12, %v448_v15 }
  0xe1   : > { %v455_v18 = vmul.f32 %v453_v16, %v433_v13 }
  0xe3   : > { %v457_v19 = vmul.f32 %v456_v14, %v455_v18 }
  0xe5   : > { %v459_v20 = vadd.f32 %v458_v17, %v457_v19 }
  0xe7   : > { %460 = vst [vmem:[%s241_s8] sm:$0x3f] %v459_v20 }
  0xe8 PF: > { %s17_s17 = sadd.s32 1, %s812_s17   ;;  %s974_s12 = smov %s796_s13 }
  0xe9   : > { %p14_p2 = scmp.ge.s32.totalorder %s17_s17, 4   ;;  %s975_s13 = smov %s800_s14 }
  0xea   : > { %s976_s14 = smov %s913_s20  ;;  %s977_s15 = smov %s808_s16 }
  0xeb   : > { %s978_s16 = smov %s980_s6  ;;  %16 = sbr.rel (!%p14_p2) target bundleno = 5 (0x5), region = 85 }
  0xf0   :  { %486 = vsyncpa [#allocation3], 1 }
  0xf1   :  { %488 = vsyncpa [#allocation3 + $0x1], 1 }
  0xf2   :  { %489 = vsyncpa [#allocation5], 1 }

</bundles_post_ra>
